<compile_context>
chip_gen: v7x
topology: tpu7x:2x2x1
jax: 0.10.0
libtpu: 0.0.40
codegen_flags: <defaults>
</compile_context>

<pallas_src>
import functools

import jax
import jax.numpy as jnp
from jax.experimental import pallas as pl
from jax.experimental.pallas import tpu as pltpu


@functools.lru_cache(maxsize=1)
def _vmem_capacity_bytes():
    """Physical per-core VMEM; conservative 64 MiB fallback if the query fails."""
    try:
        cap = int(getattr(pltpu.get_tpu_info(), "vmem_capacity_bytes", 0) or 0)
        if cap > 0:
            return cap
    except Exception:
        pass
    return 64 * 1024 * 1024


def _round_up(v, m):
    return ((v + m - 1) // m) * m


# ---------------------------------------------------------------------------
# Fused single-call path: whole x resident in VMEM, read from HBM exactly once.
# Loops over per-sample (C, HW) slabs so only ~2 f32 slabs of temporaries are
# live at a time (footprint ~= x_native + y_native + 2 slabs + scratch).
#   x_ref: (N, C, HW)   params: (C, 1)   outputs: y (N,C,HW), new_rm/rv (C,1)
# ---------------------------------------------------------------------------
def _fused_kernel(x_ref, gamma_ref, beta_ref, rm_ref, rv_ref,
                  y_ref, nrm_ref, nrv_ref, acc_sum, acc_sq,
                  *, momentum, eps, count, unbiased):
    n_samples = x_ref.shape[0]
    rm = rm_ref[...]                                     # (C, 1) f32

    acc_sum[...] = jnp.zeros_like(acc_sum)
    acc_sq[...] = jnp.zeros_like(acc_sq)

    def _stats(n, carry):
        d = x_ref[n].astype(jnp.float32) - rm            # (C, HW) slab
        acc_sum[...] += jnp.sum(d, axis=1, keepdims=True)
        acc_sq[...] += jnp.sum(d * d, axis=1, keepdims=True)
        return carry

    jax.lax.fori_loop(0, n_samples, _stats, 0)

    mean_d = acc_sum[...] * (1.0 / count)                # mean - rm
    mean = rm + mean_d
    var_b = jnp.maximum(acc_sq[...] * (1.0 / count) - mean_d * mean_d, 0.0)
    var_u = var_b * unbiased

    nrm = (1.0 - momentum) * rm + momentum * mean
    nrv = (1.0 - momentum) * rv_ref[...] + momentum * var_u
    inv = jax.lax.rsqrt(nrv + eps)
    scale = gamma_ref[...] * inv                         # (C, 1)
    bias = beta_ref[...] - nrm * scale                   # (C, 1)
    nrm_ref[...] = nrm
    nrv_ref[...] = nrv

    def _norm(n, carry):
        xf = x_ref[n].astype(jnp.float32)                # (C, HW) slab
        y_ref[n] = (xf * scale + bias).astype(y_ref.dtype)
        return carry

    jax.lax.fori_loop(0, n_samples, _norm, 0)


# ---------------------------------------------------------------------------
# Streaming two-phase path (large inputs), ONE pallas_call.
#   grid = (phase, n_block, hw_block); blocks are (tile_n, C, tile_hw).
#   phase 0: accumulate running_mean-shifted per-channel sum / sumsq.
#   phase boundary (first step of phase 1): fold EMA stats into scale/bias.
#   phase 1: y = x * scale + bias.
# ---------------------------------------------------------------------------
def _phased_kernel(x_ref, gamma_ref, beta_ref, rm_ref, rv_ref,
                   y_ref, nrm_ref, nrv_ref,
                   acc_sum, acc_sq, scale_sc, bias_sc,
                   *, momentum, eps, count, unbiased):
    phase = pl.program_id(0)
    first_block = (pl.program_id(1) == 0) & (pl.program_id(2) == 0)

    @pl.when((phase == 0) & first_block)
    def _init():
        acc_sum[...] = jnp.zeros_like(acc_sum)
        acc_sq[...] = jnp.zeros_like(acc_sq)

    @pl.when(phase == 0)
    def _accumulate():
        d = x_ref[...].astype(jnp.float32) - rm_ref[...][None]   # (tn, C, thw)
        acc_sum[...] += jnp.sum(jnp.sum(d, axis=2, keepdims=True), axis=0)
        acc_sq[...] += jnp.sum(jnp.sum(d * d, axis=2, keepdims=True), axis=0)

    @pl.when((phase == 1) & first_block)
    def _finalize():
        rm = rm_ref[...]
        mean_d = acc_sum[...] * (1.0 / count)
        mean = rm + mean_d
        var_b = jnp.maximum(acc_sq[...] * (1.0 / count) - mean_d * mean_d, 0.0)
        var_u = var_b * unbiased
        nrm = (1.0 - momentum) * rm + momentum * mean
        nrv = (1.0 - momentum) * rv_ref[...] + momentum * var_u
        inv = jax.lax.rsqrt(nrv + eps)
        sc = gamma_ref[...] * inv
        scale_sc[...] = sc
        bias_sc[...] = beta_ref[...] - nrm * sc
        nrm_ref[...] = nrm
        nrv_ref[...] = nrv

    @pl.when(phase == 1)
    def _normalize():
        xf = x_ref[...].astype(jnp.float32)
        y_ref[...] = (xf * scale_sc[...][None]
                      + bias_sc[...][None]).astype(y_ref.dtype)


def _pick_tiles(n, c, hw, itemsize, budget_bytes):
    """Choose (tile_n, tile_hw) for (tile_n, C, tile_hw) blocks of the
    (N, C, HW) view.  tile_hw is a multiple of 128 (or full HW), tile_n a
    divisor of N; the NATIVE-dtype padded block stays under budget_bytes."""
    c_pad = _round_up(c, 8)

    def blk_bytes(tn, thw):
        return tn * c_pad * _round_up(thw, 128) * itemsize

    if hw % 128 != 0 or blk_bytes(1, hw) <= budget_bytes:
        # TODO(synk): if HW is both huge and not a multiple of 128 this falls
        # back to a single-sample full-HW block (no lane tiling).
        tile_hw = hw
    else:
        tile_hw = 128
        t = 256
        while t < hw:
            if hw % t == 0 and blk_bytes(1, t) <= budget_bytes:
                tile_hw = t
            t += 128

    tile_n = 1
    for t in range(2, n + 1):
        if n % t == 0 and blk_bytes(t, tile_hw) <= budget_bytes:
            tile_n = t
    return tile_n, tile_hw


def ema_batchnorm_forward(x_nchw, gamma, beta, running_mean, running_var,
                          *, momentum=0.1, eps=1e-5, force_two_pass=False):
    """EMABatchNorm(BatchNorm2d) forward.

    x_nchw: (N, C, H, W).  Returns (y_nchw, new_running_mean, new_running_var).
    """
    N, C, H, W = x_nchw.shape
    HW = H * W
    count = float(N * HW)
    unbiased = count / max(count - 1.0, 1.0)      # guard N*H*W == 1
    itemsize = jnp.dtype(x_nchw.dtype).itemsize
    c_pad = _round_up(C, 8)
    hw_pad = _round_up(HW, 128)

    cap = _vmem_capacity_bytes()
    vmem_limit = min(int(cap * 0.70), 96 * 1024 * 1024)

    x3 = x_nchw.reshape(N, C, HW)                 # free view of the NCHW buffer
    g2 = gamma.reshape(C, 1).astype(jnp.float32)
    b2 = beta.reshape(C, 1).astype(jnp.float32)
    rm2 = running_mean.reshape(C, 1).astype(jnp.float32)
    rv2 = running_var.reshape(C, 1).astype(jnp.float32)

    kargs = dict(momentum=float(momentum), eps=float(eps),
                 count=count, unbiased=unbiased)
    stat_shapes = (jax.ShapeDtypeStruct((C, 1), jnp.float32),
                   jax.ShapeDtypeStruct((C, 1), jnp.float32))

    # ------------------- fused single-HBM-read path -------------------------
    slab_f32 = c_pad * hw_pad * 4
    fused_footprint = (2 * N * c_pad * hw_pad * itemsize    # x in + y out
                       + 2 * slab_f32 + (2 << 20))          # temps + slack
    if (not force_two_pass) and fused_footprint <= cap // 2:
        y3, nrm, nrv = pl.pallas_call(
            functools.partial(_fused_kernel, **kargs),
            out_shape=(jax.ShapeDtypeStruct((N, C, HW), x_nchw.dtype),)
                      + stat_shapes,
            scratch_shapes=[pltpu.VMEM((C, 1), jnp.float32),
                            pltpu.VMEM((C, 1), jnp.float32)],
            compiler_params=pltpu.CompilerParams(vmem_limit_bytes=vmem_limit),
        )(x3, g2, b2, rm2, rv2)
        return y3.reshape(N, C, H, W), nrm.reshape(C), nrv.reshape(C)

    # ------------------- streaming two-phase path ---------------------------
    block_budget = min(8 * 1024 * 1024, cap // 10)   # native-dtype block bytes
    tile_n, tile_hw = _pick_tiles(N, C, HW, itemsize, block_budget)
    grid = (2, N // tile_n, HW // tile_hw)

    x_spec = pl.BlockSpec((tile_n, C, tile_hw), lambda p, i, j: (i, 0, j))
    par_spec = pl.BlockSpec((C, 1), lambda p, i, j: (0, 0))
    # During phase 0 the y block index is pinned to (0, 0, 0): no writeback
    # until it is actually written at the first phase-1 step; every block is
    # then written exactly once in phase 1.
    y_spec = pl.BlockSpec((tile_n, C, tile_hw),
                          lambda p, i, j: (i * p, 0, j * p))
    stat_spec = pl.BlockSpec((C, 1), lambda p, i, j: (0, 0))

    y3, nrm, nrv = pl.pallas_call(
        functools.partial(_phased_kernel, **kargs),
        out_shape=(jax.ShapeDtypeStruct((N, C, HW), x_nchw.dtype),)
                  + stat_shapes,
        grid_spec=pltpu.PrefetchScalarGridSpec(
            num_scalar_prefetch=0,
            grid=grid,
            in_specs=[x_spec, par_spec, par_spec, par_spec, par_spec],
            out_specs=(y_spec, stat_spec, stat_spec),
            scratch_shapes=[pltpu.VMEM((C, 1), jnp.float32)] * 4),
        compiler_params=pltpu.CompilerParams(
            # TODO(synk): all axes "arbitrary" because phase 0 accumulates into
            # one scratch; a v7x megacore split would need per-core partials.
            dimension_semantics=("arbitrary", "arbitrary", "arbitrary"),
            vmem_limit_bytes=vmem_limit),
    )(x3, g2, b2, rm2, rv2)

    return y3.reshape(N, C, H, W), nrm.reshape(C), nrv.reshape(C)


def _reference(x, gamma, beta, rm, rv, momentum=0.1, eps=1e-5):
    """Pure-JAX reference mirroring PyTorch train->eval BN semantics."""
    xf = x.astype(jnp.float32)
    axes = (0, 2, 3)
    n = xf.shape[0] * xf.shape[2] * xf.shape[3]
    bm = jnp.mean(xf, axis=axes)
    bv = jnp.mean((xf - bm[None, :, None, None]) ** 2, axis=axes)
    bvu = bv * n / max(n - 1, 1)
    nrm = (1 - momentum) * rm + momentum * bm
    nrv = (1 - momentum) * rv + momentum * bvu
    y = (xf - nrm[None, :, None, None]) * jax.lax.rsqrt(
        nrv + eps)[None, :, None, None] * gamma[None, :, None, None] \
        + beta[None, :, None, None]
    return y.astype(x.dtype), nrm, nrv


if __name__ == "__main__":
    key = jax.random.PRNGKey(0)
    N, C, H, W = 2, 4, 16, 16

    x = jax.random.normal(key, (N, C, H, W), dtype=jnp.float32) * 2.0 + 0.5

    # Deterministic synthetic BatchNorm2d parameters (not a checkpoint).
    gamma = 1.0 + 0.1 * jnp.arange(C, dtype=jnp.float32)
    beta = 0.05 * jnp.arange(C, dtype=jnp.float32)
    running_mean = jnp.zeros((C,), dtype=jnp.float32)
    running_var = jnp.ones((C,), dtype=jnp.float32)

    y_ref, nrm_ref, nrv_ref = _reference(
        x, gamma, beta, running_mean, running_var)

    # Fused single-HBM-read path (the one exercised at this size).
    y, nrm, nrv = ema_batchnorm_forward(
        x, gamma, beta, running_mean, running_var, momentum=0.1, eps=1e-5)
    jax.block_until_ready(y)
    assert jnp.allclose(y, y_ref, atol=1e-4, rtol=1e-4)
    assert jnp.allclose(nrm, nrm_ref, atol=1e-4)
    assert jnp.allclose(nrv, nrv_ref, atol=1e-4)

    # Streaming two-phase path, forced for coverage.
    y2, nrm2, nrv2 = ema_batchnorm_forward(
        x, gamma, beta, running_mean, running_var, momentum=0.1, eps=1e-5,
        force_two_pass=True)
    jax.block_until_ready(y2)
    assert jnp.allclose(y2, y_ref, atol=1e-4, rtol=1e-4)
    assert jnp.allclose(nrm2, nrm_ref, atol=1e-4)
    assert jnp.allclose(nrv2, nrv_ref, atol=1e-4)

    print("KERNEL_OK")
</pallas_src>

<mosaic_0001>
module attributes {stable_mosaic.version = 11 : i64} {
  func.func @_fused_kernel(%arg0: memref<2x4x256xf32, #tpu.memory_space<vmem>>, %arg1: memref<4x1xf32, #tpu.memory_space<vmem>>, %arg2: memref<4x1xf32, #tpu.memory_space<vmem>>, %arg3: memref<4x1xf32, #tpu.memory_space<vmem>>, %arg4: memref<4x1xf32, #tpu.memory_space<vmem>>, %arg5: memref<2x4x256xf32, #tpu.memory_space<vmem>>, %arg6: memref<4x1xf32, #tpu.memory_space<vmem>>, %arg7: memref<4x1xf32, #tpu.memory_space<vmem>>, %arg8: memref<4x1xf32, #tpu.memory_space<vmem>>, %arg9: memref<4x1xf32, #tpu.memory_space<vmem>>) attributes {dimension_semantics = [], scalar_prefetch = 0 : i64, scratch_operands = 2 : i64, tpu.core_type = #tpu.core_type<tc>} {
    %c0 = arith.constant 0 : index
    %c0_0 = arith.constant 0 : index
    %0 = vector.load %arg3[%c0, %c0_0] : memref<4x1xf32, #tpu.memory_space<vmem>>, vector<4x1xf32>
    %cst = arith.constant 0.000000e+00 : f32
    %1 = vector.broadcast %cst : f32 to vector<4x1xf32>
    %c0_1 = arith.constant 0 : index
    %c0_2 = arith.constant 0 : index
    %2 = vector.load %arg8[%c0_1, %c0_2] : memref<4x1xf32, #tpu.memory_space<vmem>>, vector<4x1xf32>
    tpu.vector_store %arg8[%c0_1, %c0_2], %1 {strides = array<i32>} : memref<4x1xf32, #tpu.memory_space<vmem>>, vector<4x1xf32>,
    %cst_3 = arith.constant 0.000000e+00 : f32
    %3 = vector.broadcast %cst_3 : f32 to vector<4x1xf32>
    %c0_4 = arith.constant 0 : index
    %c0_5 = arith.constant 0 : index
    %4 = vector.load %arg9[%c0_4, %c0_5] : memref<4x1xf32, #tpu.memory_space<vmem>>, vector<4x1xf32>
    tpu.vector_store %arg9[%c0_4, %c0_5], %3 {strides = array<i32>} : memref<4x1xf32, #tpu.memory_space<vmem>>, vector<4x1xf32>,
    %c0_i32 = arith.constant 0 : i32
    %c2_i32 = arith.constant 2 : i32
    %5 = arith.addi %c0_i32, %c2_i32 : i32
    %c1_i32 = arith.constant 1 : i32
    scf.for %arg10 = %c0_i32 to %5 step %c1_i32  : i32 {
      %41 = arith.index_cast %arg10 : i32 to index
      %c0_34 = arith.constant 0 : index
      %c0_35 = arith.constant 0 : index
      %42 = vector.load %arg0[%41, %c0_34, %c0_35] : memref<2x4x256xf32, #tpu.memory_space<vmem>>, vector<1x4x256xf32>
      %43 = vector.shape_cast %42 : vector<1x4x256xf32> to vector<4x256xf32>
      %44 = vector.broadcast %0 : vector<4x1xf32> to vector<4x256xf32>
      %45 = arith.subf %43, %44 : vector<4x256xf32>
      %c0_36 = arith.constant 0 : index
      %c0_37 = arith.constant 0 : index
      %46 = vector.load %arg8[%c0_36, %c0_37] : memref<4x1xf32, #tpu.memory_space<vmem>>, vector<4x1xf32>
      %cst_38 = arith.constant dense<0.000000e+00> : vector<4xf32>
      %47 = vector.multi_reduction <add>, %45, %cst_38 [1] : vector<4x256xf32> to vector<4xf32>
      %48 = vector.shape_cast %47 : vector<4xf32> to vector<4x1xf32>
      %49 = arith.addf %46, %48 : vector<4x1xf32>
      %c0_39 = arith.constant 0 : index
      %c0_40 = arith.constant 0 : index
      %50 = vector.load %arg8[%c0_39, %c0_40] : memref<4x1xf32, #tpu.memory_space<vmem>>, vector<4x1xf32>
      tpu.vector_store %arg8[%c0_39, %c0_40], %49 {strides = array<i32>} : memref<4x1xf32, #tpu.memory_space<vmem>>, vector<4x1xf32>,
      %c0_41 = arith.constant 0 : index
      %c0_42 = arith.constant 0 : index
      %51 = vector.load %arg9[%c0_41, %c0_42] : memref<4x1xf32, #tpu.memory_space<vmem>>, vector<4x1xf32>
      %52 = arith.mulf %45, %45 : vector<4x256xf32>
      %cst_43 = arith.constant dense<0.000000e+00> : vector<4xf32>
      %53 = vector.multi_reduction <add>, %52, %cst_43 [1] : vector<4x256xf32> to vector<4xf32>
      %54 = vector.shape_cast %53 : vector<4xf32> to vector<4x1xf32>
      %55 = arith.addf %51, %54 : vector<4x1xf32>
      %c0_44 = arith.constant 0 : index
      %c0_45 = arith.constant 0 : index
      %56 = vector.load %arg9[%c0_44, %c0_45] : memref<4x1xf32, #tpu.memory_space<vmem>>, vector<4x1xf32>
      tpu.vector_store %arg9[%c0_44, %c0_45], %55 {strides = array<i32>} : memref<4x1xf32, #tpu.memory_space<vmem>>, vector<4x1xf32>,
    }
    %c2_i32_6 = arith.constant 2 : i32
    %c0_7 = arith.constant 0 : index
    %c0_8 = arith.constant 0 : index
    %6 = vector.load %arg8[%c0_7, %c0_8] : memref<4x1xf32, #tpu.memory_space<vmem>>, vector<4x1xf32>
    %cst_9 = arith.constant 0.001953125 : f32
    %7 = vector.broadcast %cst_9 : f32 to vector<4x1xf32>
    %8 = arith.mulf %6, %7 : vector<4x1xf32>
    %9 = arith.addf %0, %8 : vector<4x1xf32>
    %c0_10 = arith.constant 0 : index
    %c0_11 = arith.constant 0 : index
    %10 = vector.load %arg9[%c0_10, %c0_11] : memref<4x1xf32, #tpu.memory_space<vmem>>, vector<4x1xf32>
    %cst_12 = arith.constant 0.001953125 : f32
    %11 = vector.broadcast %cst_12 : f32 to vector<4x1xf32>
    %12 = arith.mulf %10, %11 : vector<4x1xf32>
    %13 = arith.mulf %8, %8 : vector<4x1xf32>
    %14 = arith.subf %12, %13 : vector<4x1xf32>
    %cst_13 = arith.constant 0.000000e+00 : f32
    %15 = vector.broadcast %cst_13 : f32 to vector<4x1xf32>
    %16 = arith.maximumf %14, %15 : vector<4x1xf32>
    %cst_14 = arith.constant 1.00195694 : f32
    %17 = vector.broadcast %cst_14 : f32 to vector<4x1xf32>
    %18 = arith.mulf %16, %17 : vector<4x1xf32>
    %cst_15 = arith.constant 0.899999976 : f32
    %19 = vector.broadcast %cst_15 : f32 to vector<4x1xf32>
    %20 = arith.mulf %19, %0 : vector<4x1xf32>
    %cst_16 = arith.constant 1.000000e-01 : f32
    %21 = vector.broadcast %cst_16 : f32 to vector<4x1xf32>
    %22 = arith.mulf %21, %9 : vector<4x1xf32>
    %23 = arith.addf %20, %22 : vector<4x1xf32>
    %c0_17 = arith.constant 0 : index
    %c0_18 = arith.constant 0 : index
    %24 = vector.load %arg4[%c0_17, %c0_18] : memref<4x1xf32, #tpu.memory_space<vmem>>, vector<4x1xf32>
    %cst_19 = arith.constant 0.899999976 : f32
    %25 = vector.broadcast %cst_19 : f32 to vector<4x1xf32>
    %26 = arith.mulf %25, %24 : vector<4x1xf32>
    %cst_20 = arith.constant 1.000000e-01 : f32
    %27 = vector.broadcast %cst_20 : f32 to vector<4x1xf32>
    %28 = arith.mulf %27, %18 : vector<4x1xf32>
    %29 = arith.addf %26, %28 : vector<4x1xf32>
    %cst_21 = arith.constant 9.99999974E-6 : f32
    %30 = vector.broadcast %cst_21 : f32 to vector<4x1xf32>
    %31 = arith.addf %29, %30 : vector<4x1xf32>
    %32 = math.rsqrt %31 : vector<4x1xf32>
    %c0_22 = arith.constant 0 : index
    %c0_23 = arith.constant 0 : index
    %33 = vector.load %arg1[%c0_22, %c0_23] : memref<4x1xf32, #tpu.memory_space<vmem>>, vector<4x1xf32>
    %34 = arith.mulf %33, %32 : vector<4x1xf32>
    %c0_24 = arith.constant 0 : index
    %c0_25 = arith.constant 0 : index
    %35 = vector.load %arg2[%c0_24, %c0_25] : memref<4x1xf32, #tpu.memory_space<vmem>>, vector<4x1xf32>
    %36 = arith.mulf %23, %34 : vector<4x1xf32>
    %37 = arith.subf %35, %36 : vector<4x1xf32>
    %c0_26 = arith.constant 0 : index
    %c0_27 = arith.constant 0 : index
    %38 = vector.load %arg6[%c0_26, %c0_27] : memref<4x1xf32, #tpu.memory_space<vmem>>, vector<4x1xf32>
    tpu.vector_store %arg6[%c0_26, %c0_27], %23 {strides = array<i32>} : memref<4x1xf32, #tpu.memory_space<vmem>>, vector<4x1xf32>,
    %c0_28 = arith.constant 0 : index
    %c0_29 = arith.constant 0 : index
    %39 = vector.load %arg7[%c0_28, %c0_29] : memref<4x1xf32, #tpu.memory_space<vmem>>, vector<4x1xf32>
    tpu.vector_store %arg7[%c0_28, %c0_29], %29 {strides = array<i32>} : memref<4x1xf32, #tpu.memory_space<vmem>>, vector<4x1xf32>,
    %c0_i32_30 = arith.constant 0 : i32
    %c2_i32_31 = arith.constant 2 : i32
    %40 = arith.addi %c0_i32_30, %c2_i32_31 : i32
    %c1_i32_32 = arith.constant 1 : i32
    scf.for %arg10 = %c0_i32_30 to %40 step %c1_i32_32  : i32 {
      %41 = arith.index_cast %arg10 : i32 to index
      %c0_34 = arith.constant 0 : index
      %c0_35 = arith.constant 0 : index
      %42 = vector.load %arg0[%41, %c0_34, %c0_35] : memref<2x4x256xf32, #tpu.memory_space<vmem>>, vector<1x4x256xf32>
      %43 = vector.shape_cast %42 : vector<1x4x256xf32> to vector<4x256xf32>
      %44 = vector.broadcast %34 : vector<4x1xf32> to vector<4x256xf32>
      %45 = arith.mulf %43, %44 : vector<4x256xf32>
      %46 = vector.broadcast %37 : vector<4x1xf32> to vector<4x256xf32>
      %47 = arith.addf %45, %46 : vector<4x256xf32>
      %48 = arith.index_cast %arg10 : i32 to index
      %c0_36 = arith.constant 0 : index
      %c0_37 = arith.constant 0 : index
      %49 = vector.load %arg5[%48, %c0_36, %c0_37] : memref<2x4x256xf32, #tpu.memory_space<vmem>>, vector<1x4x256xf32>
      %50 = vector.shape_cast %49 : vector<1x4x256xf32> to vector<4x256xf32>
      %51 = vector.shape_cast %47 : vector<4x256xf32> to vector<1x4x256xf32>
      tpu.vector_store %arg5[%48, %c0_36, %c0_37], %51 {strides = array<i32>} : memref<2x4x256xf32, #tpu.memory_space<vmem>>, vector<1x4x256xf32>,
    }
    %c2_i32_33 = arith.constant 2 : i32
    return
  }
}

</mosaic_0001>

<bundles_post_ra>
// kernel: tpu_custom_call.1
= control target key start
LH: loop header
LB: loop body
LE: loop exit
PB: predicated region body
PF: predicated region fallthrough
CT: control target
= control target key end

     0   :  { %13 = vsyncpa [#allocation5], 0  ;;  %vm25_vm0 = vcmask 3072   ;;  %v254_v1 = vmov 0.0   ;;  %s306_s26 = smov 0   ;;  %s357_s0 = inlined_call_operand.vmem [shape: f32[2,4,256], index: 0, kind: input, shape index: {}]   ;;  %s358_s1 = inlined_call_operand.vmem [shape: f32[4,1], index: 1, kind: input, shape index: {}]   ;;  %s359_s2 = inlined_call_operand.vmem [shape: f32[4,1], index: 2, kind: input, shape index: {}]   ;;  %s360_s3 = inlined_call_operand.vmem [shape: f32[4,1], index: 3, kind: input, shape index: {}]   ;;  %s361_s4 = inlined_call_operand.vmem [shape: f32[4,1], index: 4, kind: input, shape index: {}]   ;;  %s362_s5 = inlined_call_operand.hbm [shape: f32[2,4,256], index: 5, kind: output, shape index: {0}]   ;;  %s363_s6 = inlined_call_operand.vmem [shape: f32[4,1], index: 6, kind: output, shape index: {1}]   ;;  %s364_s7 = inlined_call_operand.vmem [shape: f32[4,1], index: 7, kind: output, shape index: {2}]  }
   0x1   :  { %v24_v0 = vld [vmem:[%s360_s3] sm:$0xf]  ;;  %26 = vst.msk [vmem:[#allocation2] sm:$0xf] %vm25_vm0, %v254_v1  ;;  %27 = vst.msk [vmem:[#allocation3] sm:$0xf] %vm25_vm0, %v254_v1 }
   0x2 LB: > { %v255_v2 = vmov 0   ;;  %v256_v3 = vmov 839922192   ;;  %v45_v5 = vlaneseq  ;;  %s184_s3 = sshll.u32 %s248_s26, 3  ;;  %vm55_vm1 = vcmask 1043456   ;;  %s33_s26 = sadd.s32 1, %s248_s26   ;;  %s248_s26 = sphi %s306_s26, %s33_s26  }
   0x3   : > { %210 = vset.pattern.permute.xlu0 %v255_v2  ;;  %v43_v4 = vunpack.c.l.s4 %v256_v3  ;;  %s36_s29 = scalar_lea.vmem %s357_s0, %s184_s3  ;;  %p30_p0 = scmp.ge.s32.totalorder %s33_s26, 2  }
   0x4   : > { %40 = vperm.xlu0 %210, %v24_v0   ;;  %v46_v7 = vshrl.u32 %v45_v5, 7  ;;  %v37_v10 = vld [vmem:[%s36_s29] sm:$0xff]  ;;  %v84_v33 = vmul.f32 (%p30_p0), 0.9, %v24_v0 }
   0x5   : > { %v44_v6 = vunpack.c.0.s8 %v43_v4  ;;  %v87_v37 = vld [vmem:[%s361_s4] sm:$0xf] (%p30_p0) }
   0x6   :  { %v88_v41 = vmul.f32 (%p30_p0), 0.9, %v87_v37  ;;  %v93_v45 = vld [vmem:[%s358_s1] sm:$0xf] (%p30_p0) }
   0x7   : > { %v312_v8 = vsub.s32 %v44_v6, %v46_v7  ;;  %v95_v48 = vld [vmem:[%s359_s2] sm:$0xf] (%p30_p0) }
   0x8   : > { %v51_v22 = vld [vmem:[#allocation2] sm:$0xf]  ;;  %v63_v24 = vld [vmem:[#allocation3] sm:$0xf] }
  0x83   : > { %v41_v9 = vpop.permute.xlu0 %40 }
  0x84   : > { %v48_v11 = vrot.slane %v41_v9, %v312_v8 }
  0x86   : > { %v50_v12 = vsub.f32 %v37_v10, %v48_v11 }
  0x88   : > { %v53_v13 = vcombine.high %v50_v12, %v50_v12  ;;  %v64_v14 = vmul.f32 %v50_v12, %v50_v12  ;;  %v56_v15 = vsel %vm55_vm1, %v50_v12, 0.0 }
  0x8a   : > { %v57_v16 = vsel %vm55_vm1, %v53_v13, 0.0  ;;  %v66_v17 = vcombine.high %v64_v14, %v64_v14  ;;  %v68_v19 = vsel %vm55_vm1, %v64_v14, 0.0 }
  0x8b   : > { %v58_v18 = vadd.f32 %v57_v16, %v56_v15 }
  0x8c   : > { %v69_v20 = vsel %vm55_vm1, %v66_v17, 0.0 }
  0x8d   : > { %59 = vadd.xlane.f32.xlu0 %v58_v18  ;;  %v70_v21 = vadd.f32 %v69_v20, %v68_v19 }
  0x8f   : > { %71 = vadd.xlane.f32.xlu1 %v70_v21 }
 0x119   :  { %32 = sbr.rel (!%p30_p0) target bundleno = 2 (0x2), region = 73 }
 0x11a   : > { %v60_v23 = vpop.xlane.xlu0 %59 }
 0x11b   : > { %v61_v25 = vadd.f32 %v60_v23, %v51_v22 }
 0x11c   : > { %v72_v26 = vpop.xlane.xlu1 %71 }
 0x11d   : > { %62 = vst.msk [vmem:[#allocation2] sm:$0xf] %vm25_vm0, %v61_v25  ;;  %v73_v27 = vadd.f32 %v72_v26, %v63_v24 }
 0x11f   : > { %74 = vst.msk [vmem:[#allocation3] sm:$0xf] %vm25_vm0, %v73_v27 }
 0x124   :  { %v75_v28 = vld [vmem:[#allocation2] sm:$0xf] }
 0x125   :  { %v76_v30 = vmul.f32 0.001953125, %v75_v28 }
 0x126   :  { %v78_v29 = vld [vmem:[#allocation3] sm:$0xf] }
 0x127   :  { %v79_v31 = vmul.f32 0.001953125, %v78_v29  ;;  %v77_v32 = vadd.f32 %v76_v30, %v24_v0  ;;  %v80_v34 = vmul.f32 %v76_v30, %v76_v30 }
 0x129   :  { %v85_v35 = vmul.f32 0.1, %v77_v32  ;;  %v81_v36 = vsub.f32 %v79_v31, %v80_v34 }
 0x12b   :  { %v86_v38 = vadd.f32 %v85_v35, %v84_v33  ;;  %v82_v39 = vmax.f32 %v81_v36, 0.0 }
 0x12d   :  { %98 = vst.msk [vmem:[%s363_s6] sm:$0xf] %vm25_vm0, %v86_v38  ;;  %v83_v40 = vmul.f32 1.0019569, %v82_v39  ;;  %s250_s6 = smov 0  }
 0x12f   :  { %v89_v42 = vmul.f32 0.1, %v83_v40 }
 0x131   :  { %v90_v43 = vadd.f32 %v89_v42, %v88_v41 }
 0x133   :  { %v91_v44 = vadd.f32 1e-05, %v90_v43  ;;  %99 = vst.msk [vmem:[%s364_s7] sm:$0xf] %vm25_vm0, %v90_v43 }
 0x135   :  { %211 = vrsqrt.f32 %v91_v44 }
 0x13f   :  { %v212_v46 = vpop.eup %211 }
 0x140   :  { %v94_v47 = vmul.f32 %v212_v46, %v93_v45 }
 0x142   :  { %v96_v49 = vmul.f32 %v94_v47, %v86_v38 }
 0x144   :  { %v97_v50 = vsub.f32 %v95_v48, %v96_v49 }
 0x145 LB: > { %v257_v51 = vmov 0   ;;  %s185_s7 = sshll.u32 %s252_s6, 3  ;;  %s105_s6 = sadd.s32 1, %s252_s6   ;;  %s252_s6 = sphi %s250_s6, %s105_s6  }
 0x146   : > { %213 = vset.pattern.permute.xlu0 %v257_v51  ;;  %s108_s1 = scalar_lea.vmem %s357_s0, %s185_s7  ;;  %s137_s2 = scalar_lea.vmem [#allocation4], %s185_s7 }
 0x147   : > { %112 = vperm.xlu0 %213, %v94_v47   ;;  %v109_v54 = vld [vmem:[%s108_s1] sm:$0xff]  ;;  %p102_p1 = scmp.ge.s32.totalorder %s105_s6, 2  }
 0x148   :  { %s258_s18 = smov (%p102_p1), [#allocation4]  }
 0x149   :  { %s144_s19 = sshll.u32 (%p102_p1), %s258_s18, 4  ;;  %s145_s19 = int_to_ptr.vmem [resolvable:$true] %s144_s19 }
 0x14a   :  { %s214_s20 = scalar_lea.vmem (%p102_p1), %s145_s19, 256  ;;  %p219_p3 = scmp.lt.s32.totalorder (%p102_p1), %s145_s19, %s145_s19 }
 0x14b   : > { %125 = vperm.xlu0 %213, %v97_v50   ;;  %p215_p2 = scmp.ne.s32.totalorder (%p102_p1), %s145_s19, %s214_s20  ;;  %p220_p4 = scmp.lt.s32.totalorder (%p102_p1), %s214_s20, %s214_s20 }
 0x14d   :  { %p221_p5 = por (%p102_p1), %p220_p4, %p219_p3 }
 0x14f   :  { %p222_p6 = pnand (%p102_p1), %p221_p5, %p215_p2 }
 0x1c6   : > { %v113_v52 = vpop.permute.xlu0 %112 }
 0x1c7   : > { %v120_v53 = vrot.slane %v113_v52, %v312_v8 }
 0x1c9   : > { %v122_v56 = vmul.f32 %v120_v53, %v109_v54  ;;  %104 = sbr.rel (!%p102_p1) target bundleno = 325 (0x145), region = 84 }
 0x1ca   : > { %v126_v55 = vpop.permute.xlu0 %125 }
 0x1cb   : > { %v133_v57 = vrot.slane %v126_v55, %v312_v8 }
 0x1cd   : > { %v135_v58 = vadd.f32 %v133_v57, %v122_v56 }
 0x1cf   : > { %138 = vst [vmem:[%s137_s2] sm:$0xff] %v135_v58 }
 0x1d0   :  { %225 = shalt.err (!%p222_p6)
}
 0x1d1   :  { %s226_s23 = scalar_lea.hbm %s362_s5, 256 }
 0x1d2   :  { %p227_p7 = scmp.ne.s32.totalorder %s362_s5, %s226_s23  ;;  %p230_p8 = scmp.lt.u32.totalorder %s226_s23, %s362_s5 }
 0x1d4   :  { %p232_p9 = pnand %p230_p8, %p227_p7 }
 0x1d6   :  { %235 = shalt.err (!%p232_p9)
}
 0x1d7   :  { %s259_s0 = smov 128   ;;  %s260_s27 = smov 8  }
 0x1d8   :  { %150 = dma.vmem_to_hbm [thread:$0]  %s145_s19, 256, %s362_s5, [#allocation5], %s259_s0, %s259_s0, %s260_s27  }
 0x1d9   :  { %244 = dma.done.wait [#allocation5], 256  }
 0x1da   :  { %245 = vsyncadd [#allocation5], 4294967040 }
 0x1db   :  { %162 = vsyncpa [#allocation5], 1 }

</bundles_post_ra>
